<compile_context>
chip_gen: v5e
topology: v5e:2x2
jax: 0.10.0
libtpu: 0.0.40
codegen_flags: <defaults>
</compile_context>

<pallas_src>
import functools

import jax
import jax.numpy as jnp
from jax.experimental import pallas as pl
from jax.experimental.pallas import tpu as pltpu

# Small deterministic architecture consistent with Network(din, dout, W, depth, skip_at)
DIN, DOUT, WIDTH, DEPTH = 4, 3, 32, 4
SKIP_AT = (1,)          # concat x after hidden layer index 1 (so layer 2 has input W+din)
N_POINTS = 256


def _rup(v, m):
    return (v + m - 1) // m * m


def _choose_tile(n):
    """Points-per-tile along the lane axis: as large as reasonable (cap 2048),
    but try to keep >= 2 grid steps so both TensorCores (v7x) get work."""
    n128 = _rup(max(n, 1), 128)
    tile = min(2048, n128)
    if tile == n128 and n128 >= 256:
        tile = _rup(n128 // 2, 128)
    return tile


def _mlp_kernel(x_ref, w_ref, b_ref, o_ref, *, width, layers, skip_slot, n_skip):
    """Feature-major MLP tile.

    x_ref : (din+1, tile_n)    bf16  raw input points (last row == 1.0 for bias folding)
    w_ref : (R, C)             bf16  all transposed weights packed row-wise
    b_ref : (Rb, n_layers)     f32   bias of layer li sits in column li (0 where folded)
    o_ref : (dout, tile_n)     f32

    layers[li] = (row_off, out_dim, out_load, in_dim); layer 0 is the fused
    [W0+b0 | x-projections (+bias) of all skip recipients] block.
    """
    n_layers = len(layers)
    xb = x_ref[...]                                      # (din+1, tile_n) bf16
    ball = b_ref[...]                                    # (Rb, n_layers)  f32

    # ---- layer 0: fused matmul produces layer-0 preacts + every skip x-term,
    #      with layer-0 / skip-layer biases already folded in via the ones row.
    r0, _, fused_load, in0 = layers[0]
    w0 = w_ref[r0:r0 + fused_load, 0:in0]                # bf16
    z = jnp.dot(w0, xb, preferred_element_type=jnp.float32)   # (fused_load, tile_n) f32
    skip_terms = [z[width * (1 + k): width * (2 + k), :] for k in range(n_skip)]

    y = jnp.maximum(z[0:width, :], 0.0)                  # ReLU (f32), bias already in z

    # ---- remaining layers ----
    for li in range(1, n_layers):
        row_off, out_dim, out_load, in_dim = layers[li]
        w = w_ref[row_off:row_off + out_load, 0:in_dim]        # bf16
        acc = jnp.dot(w, y.astype(jnp.bfloat16),
                      preferred_element_type=jnp.float32)      # (out_load, tile_n) f32
        slot = skip_slot[li]
        if slot >= 0:                                          # skip concat == split matmul
            y = acc + skip_terms[slot]                         # x-term already carries the bias
        else:
            y = acc + ball[0:out_load, li:li + 1]              # lane-broadcast bias add
        if li != n_layers - 1:
            y = jnp.maximum(y, 0.0)                            # ReLU on hidden layers
        else:
            y = jax.nn.sigmoid(y)                              # sigmoid on output layer
        if out_load != out_dim:
            y = y[:out_dim, :]                                 # drop zero-padded rows

    o_ref[...] = y.astype(o_ref.dtype)


def _pack_params(weights, biases, skip_at):
    """Pack all (transposed) weights into one bf16 buffer and the un-folded biases
    into one f32 buffer; fuse the skip x-projections (and their biases, plus
    layer-0's bias) into layer 0's weight block."""
    n_layers = len(weights)
    din, width = weights[0].shape
    assert width % 8 == 0, "hidden width must be a multiple of 8"

    skip_layers = [li for li in range(1, n_layers) if (li - 1) in skip_at]
    slot_of = {li: k for k, li in enumerate(skip_layers)}

    # fused layer-0 weight: [W0 | x-part of every skip recipient's weight]
    # plus one extra input row holding [b0 | b_skip...] (dotted against the ones row).
    w0_cat = jnp.concatenate(
        [weights[0]] + [weights[li][width:, :] for li in skip_layers], axis=1)   # (din, W*(1+k))
    b0_cat = jnp.concatenate(
        [biases[0]] + [biases[li] for li in skip_layers], axis=0)                # (W*(1+k),)
    w0_aug = jnp.concatenate([w0_cat, b0_cat[None, :]], axis=0)                  # (din+1, W*(1+k))

    blocks = [w0_aug.T]                                  # each block is (out, in)
    for li in range(1, n_layers):
        w = weights[li]
        wy = w[:width, :] if (li - 1) in skip_at else w
        blocks.append(wy.T)

    ncols = max(b.shape[1] for b in blocks)
    layers, skip_slot = [], []
    off = 0
    for li, blk in enumerate(blocks):
        out_dim, in_dim = blk.shape
        layers.append((off, out_dim, _rup(out_dim, 8), in_dim))
        skip_slot.append(slot_of.get(li, -1))
        off += _rup(out_dim, 16)                         # bf16 row-pair alignment
    rtot = _rup(off, 16)

    wbuf = jnp.zeros((rtot, ncols), jnp.float32)
    for (row, _, _, _), blk in zip(layers, blocks):
        wbuf = wbuf.at[row:row + blk.shape[0], :blk.shape[1]].set(blk)
    wbuf = wbuf.astype(jnp.bfloat16)

    rb = max(width, max((l[2] for l in layers[1:]), default=width))
    bbuf = jnp.zeros((rb, n_layers), jnp.float32)
    for li, b in enumerate(biases):
        if li == 0 or li in slot_of:
            continue                                     # folded into the layer-0 matmul
        bbuf = bbuf.at[: b.shape[0], li].set(b)

    return wbuf, bbuf, tuple(layers), tuple(skip_slot), len(skip_layers), width, din


def mlp_forward(x, weights, biases, skip_at, tile_n=None):
    """x: (N, din); weights[li]: (in_dim, out_dim) (= PyTorch weight.T); biases[li]: (out,)."""
    n, din = x.shape
    dout = weights[-1].shape[1]
    wbuf, bbuf, layers, skip_slot, n_skip, width, din_w = _pack_params(
        weights, biases, skip_at)
    assert din == din_w

    if tile_n is None:
        tile_n = _choose_tile(n)
    num_tiles = pl.cdiv(n, tile_n)
    n_pad = num_tiles * tile_n

    # feature-major bf16 stream with an appended constant-ones row (bias folding)
    xt = jnp.concatenate([x.T, jnp.ones((1, n), x.dtype)], axis=0).astype(jnp.bfloat16)
    if n_pad != n:
        xt = jnp.pad(xt, ((0, 0), (0, n_pad - n)))

    kernel = functools.partial(_mlp_kernel, width=width, layers=layers,
                               skip_slot=skip_slot, n_skip=n_skip)

    out_t = pl.pallas_call(
        kernel,
        out_shape=jax.ShapeDtypeStruct((dout, n_pad), jnp.float32),
        grid=(num_tiles,),
        in_specs=[
            pl.BlockSpec((din + 1, tile_n), lambda i: (0, i)),   # points stream along lanes
            pl.BlockSpec(wbuf.shape, lambda i: (0, 0)),          # packed weights, resident
            pl.BlockSpec(bbuf.shape, lambda i: (0, 0)),          # packed biases, resident
        ],
        out_specs=pl.BlockSpec((dout, tile_n), lambda i: (0, i)),
        compiler_params=pltpu.CompilerParams(
            dimension_semantics=("parallel",)),
    )(xt, wbuf, bbuf)

    return out_t[:, :n].T.astype(x.dtype)


def ref_forward(x, weights, biases, skip_at):
    """Pure-JAX f32 reference matching the PyTorch forward exactly."""
    y = x
    n = len(weights)
    for li in range(n):
        y = y @ weights[li] + biases[li]
        y = jax.nn.relu(y) if li != n - 1 else jax.nn.sigmoid(y)
        if li in skip_at:
            y = jnp.concatenate([y, x], -1)
    return y


def build_params(key):
    n_layers = DEPTH + 1
    dims = [(DIN, WIDTH)]                                            # first layer
    for li in range(1, DEPTH):                                       # hidden layers
        d_in = WIDTH + DIN if (li - 1) in SKIP_AT else WIDTH
        dims.append((d_in, WIDTH))
    dims.append((WIDTH, DOUT))                                       # output layer

    keys = jax.random.split(key, 2 * n_layers)
    weights, biases = [], []
    for li, (d_in, d_out) in enumerate(dims):
        wk, bk = keys[2 * li], keys[2 * li + 1]
        w = jax.random.normal(wk, (d_in, d_out), jnp.float32) / jnp.sqrt(float(d_in))
        b = 0.01 * jax.random.normal(bk, (d_out,), jnp.float32)
        weights.append(w)
        biases.append(b)
    return weights, biases


if __name__ == "__main__":
    key = jax.random.PRNGKey(0)
    kx, kp = jax.random.split(key)
    weights, biases = build_params(kp)

    # main check
    x = jax.random.uniform(kx, (N_POINTS, DIN), jnp.float32)
    out = jax.block_until_ready(mlp_forward(x, weights, biases, SKIP_AT))
    exp = ref_forward(x, weights, biases, SKIP_AT)
    assert out.shape == (N_POINTS, DOUT), out.shape
    err = float(jnp.max(jnp.abs(out - exp)))
    assert err < 2e-2, err          # bf16 MXU operands vs f32 reference

    # ragged N (exercises pl.cdiv grid + wrapper-side padding of the lane axis)
    x2 = jax.random.uniform(kx, (200, DIN), jnp.float32)
    out2 = jax.block_until_ready(mlp_forward(x2, weights, biases, SKIP_AT))
    exp2 = ref_forward(x2, weights, biases, SKIP_AT)
    assert out2.shape == (200, DOUT), out2.shape
    err2 = float(jnp.max(jnp.abs(out2 - exp2)))
    assert err2 < 2e-2, err2

    print("KERNEL_OK")
</pallas_src>

<mosaic_0001>
module attributes {stable_mosaic.version = 11 : i64} {
  func.func @_mlp_kernel(%arg0: i32, %arg1: memref<5x128xbf16, #tpu.memory_space<vmem>>, %arg2: memref<176x32xbf16, #tpu.memory_space<vmem>>, %arg3: memref<32x5xf32, #tpu.memory_space<vmem>>, %arg4: memref<3x128xf32, #tpu.memory_space<vmem>>) attributes {dimension_semantics = [#tpu.dimension_semantics<parallel>], iteration_bounds = array<i64: 2>, scalar_prefetch = 0 : i64, scratch_operands = 0 : i64, tpu.core_type = #tpu.core_type<tc>, window_params = [{transform_indices = @transform_0, window_bounds = array<i64: 5, 128>}, {pipeline_mode = #tpu.pipeline_mode<synchronous>, transform_indices = @transform_1, window_bounds = array<i64: 176, 32>}, {pipeline_mode = #tpu.pipeline_mode<synchronous>, transform_indices = @transform_2, window_bounds = array<i64: 32, 5>}, {transform_indices = @transform_3, window_bounds = array<i64: 3, 128>}]} {
    %c0 = arith.constant 0 : index
    %c0_0 = arith.constant 0 : index
    %0 = vector.load %arg1[%c0, %c0_0] : memref<5x128xbf16, #tpu.memory_space<vmem>>, vector<5x128xbf16>
    %c0_1 = arith.constant 0 : index
    %c0_2 = arith.constant 0 : index
    %1 = vector.load %arg3[%c0_1, %c0_2] : memref<32x5xf32, #tpu.memory_space<vmem>>, vector<32x5xf32>
    %c0_3 = arith.constant 0 : index
    %c0_4 = arith.constant 0 : index
    %2 = vector.load %arg2[%c0_3, %c0_4] : memref<176x32xbf16, #tpu.memory_space<vmem>>, vector<64x5xbf16>
    %cst = arith.constant dense<0.000000e+00> : vector<64x128xf32>
    %3 = tpu.matmul %2, %0, %cst {dimension_numbers = #tpu.dot_dimension_numbers<[1], [0], [0], [1], [0, 0, 1, 1], [], []>} : vector<64x5xbf16>, vector<5x128xbf16>, vector<64x128xf32> -> vector<64x128xf32>
    %4 = vector.extract_strided_slice %3 {offsets = [32, 0], sizes = [32, 128], strides = [1, 1]} : vector<64x128xf32> to vector<32x128xf32>
    %5 = vector.extract_strided_slice %3 {offsets = [0, 0], sizes = [32, 128], strides = [1, 1]} : vector<64x128xf32> to vector<32x128xf32>
    %cst_5 = arith.constant 0.000000e+00 : f32
    %6 = vector.broadcast %cst_5 : f32 to vector<32x128xf32>
    %7 = arith.maximumf %5, %6 : vector<32x128xf32>
    %c64 = arith.constant 64 : index
    %c0_6 = arith.constant 0 : index
    %8 = vector.load %arg2[%c64, %c0_6] : memref<176x32xbf16, #tpu.memory_space<vmem>>, vector<32x32xbf16>
    %9 = arith.truncf %7 : vector<32x128xf32> to vector<32x128xbf16>
    %cst_7 = arith.constant dense<0.000000e+00> : vector<32x128xf32>
    %10 = tpu.matmul %8, %9, %cst_7 {dimension_numbers = #tpu.dot_dimension_numbers<[1], [0], [0], [1], [0, 0, 1, 1], [], []>} : vector<32x32xbf16>, vector<32x128xbf16>, vector<32x128xf32> -> vector<32x128xf32>
    %11 = vector.extract_strided_slice %1 {offsets = [0, 1], sizes = [32, 1], strides = [1, 1]} : vector<32x5xf32> to vector<32x1xf32>
    %12 = vector.broadcast %11 : vector<32x1xf32> to vector<32x128xf32>
    %13 = arith.addf %10, %12 : vector<32x128xf32>
    %cst_8 = arith.constant 0.000000e+00 : f32
    %14 = vector.broadcast %cst_8 : f32 to vector<32x128xf32>
    %15 = arith.maximumf %13, %14 : vector<32x128xf32>
    %c96 = arith.constant 96 : index
    %c0_9 = arith.constant 0 : index
    %16 = vector.load %arg2[%c96, %c0_9] : memref<176x32xbf16, #tpu.memory_space<vmem>>, vector<32x32xbf16>
    %17 = arith.truncf %15 : vector<32x128xf32> to vector<32x128xbf16>
    %cst_10 = arith.constant dense<0.000000e+00> : vector<32x128xf32>
    %18 = tpu.matmul %16, %17, %cst_10 {dimension_numbers = #tpu.dot_dimension_numbers<[1], [0], [0], [1], [0, 0, 1, 1], [], []>} : vector<32x32xbf16>, vector<32x128xbf16>, vector<32x128xf32> -> vector<32x128xf32>
    %19 = arith.addf %18, %4 : vector<32x128xf32>
    %cst_11 = arith.constant 0.000000e+00 : f32
    %20 = vector.broadcast %cst_11 : f32 to vector<32x128xf32>
    %21 = arith.maximumf %19, %20 : vector<32x128xf32>
    %c128 = arith.constant 128 : index
    %c0_12 = arith.constant 0 : index
    %22 = vector.load %arg2[%c128, %c0_12] : memref<176x32xbf16, #tpu.memory_space<vmem>>, vector<32x32xbf16>
    %23 = arith.truncf %21 : vector<32x128xf32> to vector<32x128xbf16>
    %cst_13 = arith.constant dense<0.000000e+00> : vector<32x128xf32>
    %24 = tpu.matmul %22, %23, %cst_13 {dimension_numbers = #tpu.dot_dimension_numbers<[1], [0], [0], [1], [0, 0, 1, 1], [], []>} : vector<32x32xbf16>, vector<32x128xbf16>, vector<32x128xf32> -> vector<32x128xf32>
    %25 = vector.extract_strided_slice %1 {offsets = [0, 3], sizes = [32, 1], strides = [1, 1]} : vector<32x5xf32> to vector<32x1xf32>
    %26 = vector.broadcast %25 : vector<32x1xf32> to vector<32x128xf32>
    %27 = arith.addf %24, %26 : vector<32x128xf32>
    %cst_14 = arith.constant 0.000000e+00 : f32
    %28 = vector.broadcast %cst_14 : f32 to vector<32x128xf32>
    %29 = arith.maximumf %27, %28 : vector<32x128xf32>
    %c160 = arith.constant 160 : index
    %c0_15 = arith.constant 0 : index
    %30 = vector.load %arg2[%c160, %c0_15] : memref<176x32xbf16, #tpu.memory_space<vmem>>, vector<8x32xbf16>
    %31 = arith.truncf %29 : vector<32x128xf32> to vector<32x128xbf16>
    %cst_16 = arith.constant dense<0.000000e+00> : vector<8x128xf32>
    %32 = tpu.matmul %30, %31, %cst_16 {dimension_numbers = #tpu.dot_dimension_numbers<[1], [0], [0], [1], [0, 0, 1, 1], [], []>} : vector<8x32xbf16>, vector<32x128xbf16>, vector<8x128xf32> -> vector<8x128xf32>
    %33 = vector.extract_strided_slice %1 {offsets = [0, 4], sizes = [8, 1], strides = [1, 1]} : vector<32x5xf32> to vector<8x1xf32>
    %34 = vector.broadcast %33 : vector<8x1xf32> to vector<8x128xf32>
    %35 = arith.addf %32, %34 : vector<8x128xf32>
    %36 = arith.negf %35 : vector<8x128xf32>
    %37 = math.exp %36 : vector<8x128xf32>
    %cst_17 = arith.constant 1.000000e+00 : f32
    %38 = vector.broadcast %cst_17 : f32 to vector<8x128xf32>
    %39 = arith.addf %38, %37 : vector<8x128xf32>
    %40 = arith.divf %38, %39 : vector<8x128xf32>
    %41 = vector.extract_strided_slice %40 {offsets = [0, 0], sizes = [3, 128], strides = [1, 1]} : vector<8x128xf32> to vector<3x128xf32>
    %c0_18 = arith.constant 0 : index
    %c0_19 = arith.constant 0 : index
    %42 = vector.load %arg4[%c0_18, %c0_19] : memref<3x128xf32, #tpu.memory_space<vmem>>, vector<3x128xf32>
    tpu.vector_store %arg4[%c0_18, %c0_19], %41 {strides = array<i32>} : memref<3x128xf32, #tpu.memory_space<vmem>>, vector<3x128xf32>,
    return
  }
  func.func @transform_0(%arg0: i32) -> (i32, i32) {
    %c0_i32 = arith.constant 0 : i32
    %c0_i32_0 = arith.constant 0 : i32
    return %c0_i32, %arg0 : i32, i32
  }
  func.func @transform_1(%arg0: i32) -> (i32, i32) {
    %c0_i32 = arith.constant 0 : i32
    %c0_i32_0 = arith.constant 0 : i32
    %c0_i32_1 = arith.constant 0 : i32
    return %c0_i32, %c0_i32_0 : i32, i32
  }
  func.func @transform_2(%arg0: i32) -> (i32, i32) {
    %c0_i32 = arith.constant 0 : i32
    %c0_i32_0 = arith.constant 0 : i32
    %c0_i32_1 = arith.constant 0 : i32
    return %c0_i32, %c0_i32_0 : i32, i32
  }
  func.func @transform_3(%arg0: i32) -> (i32, i32) {
    %c0_i32 = arith.constant 0 : i32
    %c0_i32_0 = arith.constant 0 : i32
    return %c0_i32, %arg0 : i32, i32
  }
}

</mosaic_0001>

<bundles_post_ra>
// kernel: tpu_custom_call.1
= control target key start
LH: loop header
LB: loop body
LE: loop exit
PB: predicated region body
PF: predicated region fallthrough
CT: control target
= control target key end

     0   :  { %8 = vsyncpa [#allocation3], 0  ;;  %s904_s0 = inlined_call_operand.vmem [shape: bf16[5,256], index: 0, kind: input, shape index: {}]   ;;  %s905_s1 = inlined_call_operand.vmem [shape: bf16[176,32], index: 1, kind: input, shape index: {}]   ;;  %s906_s2 = inlined_call_operand.vmem [shape: f32[32,5], index: 2, kind: input, shape index: {}]   ;;  %s907_s3 = inlined_call_operand.hbm [shape: f32[3,256], index: 3, kind: output, shape index: {}]  }
   0x1   :  { %10 = vsyncpa [#allocation3 + $0x1], 0  ;;  %s758_s12 = smov 0   ;;  %s760_s13 = smov 0  }
   0x2   :  { %s762_s14 = smov 0   ;;  %s764_s15 = smov 0  }
   0x3 LB: > { %s779_s16 = sadd.s32 4294967295, %s732_s15   ;;  %s543_s17 = sadd.s32 4294967294, %s732_s15   ;;  %s732_s15 = sphi %s764_s15, %s913_s15   ;;  %s728_s14 = sphi %s762_s14, %s912_s14   ;;  %s724_s13 = sphi %s760_s13, %s911_s13   ;;  %s720_s12 = sphi %s758_s12, %s910_s12  }
   0x4   : > { %s783_s18 = sadd.s32 1, %s732_s15   ;;  %s91_s19 = sadd.s32 1, %s728_s14 }
   0x5   : > { %s88_s20 = ssub.s32 %s732_s15, %s783_s18  ;;  %p101_p0 = scmp.ne.s32.totalorder %s728_s14, %s724_s13 }
   0x6   : > { %p89_p1 = scmp.eq.s32.totalorder %s88_s20, 0  ;;  %p102_p2 = scmp.eq.s32.totalorder %s779_s16, 1 }
   0x7   : > { %p107_p3 = scmp.ne.s32.totalorder %s724_s13, %s720_s12  ;;  %p108_p4 = scmp.eq.s32.totalorder %s543_s17, 1 }
   0x8   : > { %s794_s21 = scalar_select %p89_p1, %s728_s14, %s91_s19  }
   0x9   : > { %p796_p5 = por %p102_p2, %p101_p0  ;;  %p800_p6 = por %p108_p4, %p107_p3 }
   0xa   : > { %p546_p7 = scmp.ge.s32.totalorder %s732_s15, 1  ;;  %p139_p8 = scmp.lt.s32.totalorder %s732_s15, 3 }
   0xc   : > { %p140_p9 = pnand %p546_p7, %p139_p8 }
   0xd   : > { %p162_p10 = scmp.lt.s32.totalorder (!%p140_p9), %s779_s16, 1  ;;  %s159_s20 = sand.u32 (!%p140_p9), 1, %s724_s13  }
   0xe   : > { %143 = sbr.rel (%p140_p9) target bundleno = 850 (0x352), region = 32  ;;  %s690_s9 = scalar_lea.hbm (!%p140_p9), %s907_s3, 8 }
  0x13   : > { %vm213_vm0 = vcmask 1041408   ;;  %vm214_vm1 = vcmask 1042432   ;;  %v734_v0 = vmov 65535   ;;  %s163_s24 = scalar_select %p162_p10, %s779_s16, 1  ;;  %v605_v5 = vld [vmem:[%s905_s1] sm:$0xff]  ;;  %vm200_vm2 = vcmask 39936  }
  0x14   : > { %v215_v1 = vsel %vm213_vm0, 4294967295, %v734_v0  ;;  %v606_v6 = vld [vmem:[%s905_s1 + $0x8] sm:$0xff]  ;;  %v822_v8 = vld [vmem:[%s906_s2] sm:$0xff]  ;;  %v735_v9 = vmov 1   ;;  %v170_v12 = vld [vmem:[%s906_s2 + $0x10] sm:$0xff]  ;;  %vm289_vm3 = vcmask 261120  }
  0x15   : > { %s548_s25 = sshll.u32 %s163_s24, 2  ;;  %v216_v2 = vsel %vm214_vm1, %v215_v1, 0  ;;  %660 = vset.pattern.permute.xlu1 %v735_v9  ;;  %659 = vset.pattern.permute.xlu0 %v735_v9  ;;  %v169_v13 = vld [vmem:[%s906_s2 + $0x8] sm:$0xff]  ;;  %v171_v17 = vld [vmem:[%s906_s2 + $0x18] sm:$0xff]  ;;  %v609_v22 = vld [vmem:[%s905_s1 + $0x20] sm:$0xff]  ;;  %v736_v49 = vmov 3  }
  0x16   : > { %s165_s28 = scalar_lea.vmem %s904_s0, %s548_s25  ;;  %261 = vperm.xlu1 %660, %v822_v8   ;;  %271 = vperm.xlu0 %659, %v170_v12   ;;  %v610_v23 = vld [vmem:[%s905_s1 + $0x28] sm:$0xff]  ;;  %v608_v24 = vld [vmem:[%s905_s1 + $0x18] sm:$0xff]  ;;  %v607_v26 = vld [vmem:[%s905_s1 + $0x10] sm:$0xff]  ;;  %s547_s24 = sshll.u32 %s159_s20, 2 }
  0x17   : > { %v167_v3 = vld [vmem:[%s165_s28] sm:$0x7]  ;;  %v611_v44 = vld [vmem:[%s905_s1 + $0x30] sm:$0xff]  ;;  %v612_v45 = vld [vmem:[%s905_s1 + $0x38] sm:$0xff]  ;;  %661 = vset.pattern.permute.xlu2 %v736_v49  ;;  %s602_s25 = sshll.u32 %s779_s16, 2  ;;  %s161_s29 = scalar_lea.vmem [#allocation2], %s547_s24 }
  0x18   : > { %v218_v4 = vand.u32 %v216_v2, %v167_v3  ;;  %379 = vperm.xlu2 %661, %v170_v12   ;;  %v613_v1 = vld [vmem:[%s905_s1 + $0x40] sm:$0xff]  ;;  %v614_v2 = vld [vmem:[%s905_s1 + $0x48] sm:$0xff]  ;;  %s479_s28 = scalar_lea.hbm %s907_s3, %s602_s25  ;;  %s481_s30 = sshll.u32 %s161_s29, 4  ;;  %s482_s30 = int_to_ptr.vmem [resolvable:$true] %s481_s30 }
  0x19   : > { %s483_s4 = sshll.u32 %s479_s28, 4  ;;  %s469_s16 = scalar_lea.sflag [#allocation3], %s159_s20  ;;  %s484_s4 = int_to_ptr.hbm [resolvable:$true] %s483_s4 }
  0x1a   : > { %227 = vmatpush.bf16.msra.mxu0 %v218_v4  ;;  %615 = vmatpush.bf16.msra.mxu2 %v218_v4  ;;  %v737_v4 = vmov 4   ;;  %s684_s5 = sshra.s32 %s484_s4, 4  ;;  %s685_s5 = int_to_ptr.hbm [resolvable:$true] %s684_s5 }
  0x1b   : > { %s686_s6 = scalar_lea.hbm %s685_s5, 4  ;;  %p691_p0 = scmp.lt.s32.totalorder %s685_s5, %s907_s3 }
  0x1c   : > { %p687_p11 = scmp.ne.s32.totalorder %s685_s5, %s686_s6  ;;  %p692_p1 = scmp.lt.s32.totalorder %s690_s9, %s686_s6 }
  0x1d   : > { %565 = vmatmul.msk.bf16.vlgmr.msra.gmra.mxu0 %vm200_vm2, %v605_v5  ;;  %568 = vmatmul.msk.bf16.vlgmr.msra.gmra.mxu2 %vm200_vm2, %v608_v24 }
  0x1e   : > { %266 = vperm.xlu1 %660, %v169_v13   ;;  %276 = vperm.xlu0 %659, %v171_v17   ;;  %p688_p12 = pnand %p687_p11, %p796_p5  ;;  %p693_p2 = por %p692_p1, %p691_p0 }
  0x20   : > { %383 = vperm.xlu2 %661, %v171_v17   ;;  %p689_p13 = pneg %p688_p12 }
  0x22   : > { %p694_p3 = pnand %p693_p2, %p689_p13 }
  0x26   : > { %662 = vset.pattern.permute.xlu0 %v736_v49  ;;  %663 = vset.pattern.permute.xlu1 %v736_v49 }
  0x27   : > { %371 = vperm.xlu0 %662, %v822_v8   ;;  %375 = vperm.xlu1 %663, %v169_v13  }
  0x28   : > { %664 = vset.pattern.permute.xlu2 %v737_v4 }
  0x29   : > { %429 = vperm.xlu2 %664, %v822_v8   ;;  %v425_v8 = vld [vmem:[%s905_s1 + $0x50] sm:$0xf] }
  0x2d   : > { %566 = vmatmul.msk.bf16.gmra.mxu0 %vm200_vm2, %v606_v6 }
  0x2f   : > { %665 = vset.pattern.permute.xlu0 %v737_v4 }
  0x3d   : > { %567 = vmatmul.msk.bf16.gmra.mxu0 %vm200_vm2, %v607_v26 }
  0x72   : > { %v380_v6 = vpop.permute.xlu2 %379 }
  0x7a   : > { %v384_v12 = vpop.permute.xlu2 %383 }
  0x88   : > { %v262_v28 = vpop.permute.xlu1 %261  ;;  %v272_v29 = vpop.permute.xlu0 %271 }
  0x90   : > { %v267_v31 = vpop.permute.xlu1 %266  ;;  %v277_v33 = vpop.permute.xlu0 %276 }
  0x99   : > { %v376_v9 = vpop.permute.xlu1 %375 }
  0x9a   : > { %v229_v7 = vpop.f32.mrf.mxu0 }
  0x9b   : > { %v249_v20 = vmax.f32 %v229_v7, 0.0 }
  0xa0   : > { %v244_v46 = vpop.f32.mrf.mxu2 }
  0xa2   : > { %v231_v10 = vpop.f32.mrf.mxu0 }
  0xa3   : > { %v250_v18 = vmax.f32 %v231_v10, 0.0  ;;  %v372_v10 = vpop.permute.xlu0 %371 }
  0xa5   : > { %v257_v21 = vpack.c.bf16 %v250_v18, %v249_v20 }
  0xa8   : > { %v246_v47 = vpop.f32.mrf.mxu2 }
  0xaa   : > { %v234_v11 = vpop.f32.mrf.mxu0 }
  0xab   : > { %v251_v15 = vmax.f32 %v234_v11, 0.0 }
  0xb2   : > { %v236_v14 = vpop.f32.mrf.mxu0 }
  0xb3   : > { %v252_v16 = vmax.f32 %v236_v14, 0.0 }
  0xb5   : > { %v258_v19 = vpack.c.bf16 %v252_v16, %v251_v15 }
  0xb7   : > { %302 = vmatpush.bf16.msra.mxu1 %v258_v19 }
  0xba   : > { %v239_v51 = vpop.f32.mrf.mxu0 }
  0xbb   : > { %303 = vmatpush.bf16.msra.mxu1 %v257_v21 }
  0xbe   : > { %577 = vmatmul.msk.bf16.vlgmr.msra.gmra.mxu1 %vm289_vm3, %v609_v22 }
  0xc2   : > { %v241_v53 = vpop.f32.mrf.mxu0 }
  0xce   : > { %578 = vmatmul.msk.bf16.gmra.mxu1 %vm289_vm3, %v610_v23  ;;  %v430_v23 = vpop.permute.xlu2 %429 }
 0x13b   : > { %v305_v25 = vpop.f32.mrf.mxu1 }
 0x13c   : > { %v306_v37 = vadd.f32 %v305_v25, %v262_v28 }
 0x13e   : > { %v315_v42 = vmax.f32 %v306_v37, 0.0 }
 0x143   : > { %v307_v27 = vpop.f32.mrf.mxu1 }
 0x144   : > { %v308_v35 = vadd.f32 %v307_v27, %v267_v31 }
 0x146   : > { %v316_v40 = vmax.f32 %v308_v35, 0.0 }
 0x148   : > { %v323_v43 = vpack.c.bf16 %v316_v40, %v315_v42 }
 0x14b   : > { %v310_v30 = vpop.f32.mrf.mxu1 }
 0x14c   : > { %v311_v32 = vadd.f32 %v310_v30, %v272_v29 }
 0x14e   : > { %v317_v38 = vmax.f32 %v311_v32, 0.0 }
 0x153   : > { %v312_v34 = vpop.f32.mrf.mxu1 }
 0x154   : > { %v313_v36 = vadd.f32 %v312_v34, %v277_v33 }
 0x156   : > { %v318_v39 = vmax.f32 %v313_v36, 0.0 }
 0x158   : > { %v324_v41 = vpack.c.bf16 %v318_v39, %v317_v38 }
 0x15a   : > { %347 = vmatpush.bf16.msrb.mxu2 %v324_v41 }
 0x15e   : > { %348 = vmatpush.bf16.msrb.mxu2 %v323_v43 }
 0x161   : > { %587 = vmatmul.msk.bf16.vlgmr.msrb.gmra.mxu2 %vm289_vm3, %v611_v44 }
 0x171   : > { %588 = vmatmul.msk.bf16.gmra.mxu2 %vm289_vm3, %v612_v45 }
 0x1e4   : > { %v350_v48 = vpop.f32.mrf.mxu2 }
 0x1e5   : > { %v351_v58 = vadd.f32 %v350_v48, %v239_v51 }
 0x1e7   : > { %v360_v63 = vmax.f32 %v351_v58, 0.0 }
 0x1ec   : > { %v352_v50 = vpop.f32.mrf.mxu2 }
 0x1ed   : > { %v353_v56 = vadd.f32 %v352_v50, %v241_v53 }
 0x1ef   : > { %v361_v61 = vmax.f32 %v353_v56, 0.0 }
 0x1f1   : > { %v368_v0 = vpack.c.bf16 %v361_v61, %v360_v63 }
 0x1f4   : > { %v355_v52 = vpop.f32.mrf.mxu2 }
 0x1f5   : > { %v356_v54 = vadd.f32 %v355_v52, %v244_v46 }
 0x1f7   : > { %v362_v59 = vmax.f32 %v356_v54, 0.0 }
 0x1fc   : > { %v357_v55 = vpop.f32.mrf.mxu2 }
 0x1fd   : > { %v358_v57 = vadd.f32 %v357_v55, %v246_v47 }
 0x1ff   : > { %v363_v60 = vmax.f32 %v358_v57, 0.0 }
 0x201   : > { %v369_v62 = vpack.c.bf16 %v363_v60, %v362_v59 }
 0x203   : > { %408 = vmatpush.bf16.msra.mxu3 %v369_v62 }
 0x207   : > { %409 = vmatpush.bf16.msra.mxu3 %v368_v0 }
 0x20a   : > { %597 = vmatmul.msk.bf16.vlgmr.msra.gmra.mxu3 %vm289_vm3, %v613_v1 }
 0x21a   : > { %598 = vmatmul.msk.bf16.gmra.mxu3 %vm289_vm3, %v614_v2 }
 0x28d   : > { %v411_v3 = vpop.f32.mrf.mxu3 }
 0x28e   : > { %v412_v16 = vadd.f32 %v411_v3, %v372_v10 }
 0x290   : > { %v421_v21 = vmax.f32 %v412_v16, 0.0 }
 0x295   : > { %v413_v5 = vpop.f32.mrf.mxu3 }
 0x296   : > { %v414_v14 = vadd.f32 %v413_v5, %v376_v9 }
 0x298   : > { %v422_v19 = vmax.f32 %v414_v14, 0.0 }
 0x29a   : > { %v426_v22 = vpack.c.bf16 %v422_v19, %v421_v21 }
 0x29d   : > { %v416_v7 = vpop.f32.mrf.mxu3 }
 0x29e   : > { %v417_v11 = vadd.f32 %v416_v7, %v380_v6 }
 0x2a0   : > { %v423_v17 = vmax.f32 %v417_v11, 0.0 }
 0x2a5   : > { %v418_v13 = vpop.f32.mrf.mxu3 }
 0x2a6   : > { %v419_v15 = vadd.f32 %v418_v13, %v384_v12 }
 0x2a8   : > { %v424_v18 = vmax.f32 %v419_v15, 0.0 }
 0x2aa   : > { %v427_v20 = vpack.c.bf16 %v424_v18, %v423_v17 }
 0x2ac   : > { %441 = vmatpush.bf16.msrb.mxu1 %v427_v20 }
 0x2b0   : > { %442 = vmatpush.bf16.msrb.mxu1 %v426_v22 }
 0x2b3   : > { %599 = vmatmul.msk.bf16.vlgmr.msrb.gmra.mxu1 %vm289_vm3, %v425_v8 }
 0x330   : > { %v444_v24 = vpop.f32.mrf.mxu1 }
 0x331   : > { %v445_v25 = vadd.f32 %v444_v24, %v430_v23 }
 0x333   : > { %v600_v26 = vmul.f32 -1.442695, %v445_v25 }
 0x335   : > { %666 = vpow2.f32 %v600_v26 }
 0x338   : > { %v446_v27 = vpop.f32.mrf.mxu1 }
 0x33b   : > { %v667_v28 = vpop.eup %666 }
 0x33c   : > { %v451_v29 = vadd.f32 1.0, %v667_v28 }
 0x33e   : > { %668 = vrcp.f32 %v451_v29  ;;  %v463_v33 = vand.u32 2147483648, %v451_v29  ;;  %v461_v35 = vand.u32 2147483647, %v451_v29  ;;  %vm457_vm5 = vweird.f32 %v451_v29 }
 0x340   : > { %v464_v37 = vor.u32 1.1754944e-38, %v463_v33  ;;  %vm462_vm7 = vcmp.eq.f32.partialorder %v461_v35, 8.507059e+37 }
 0x344   : > { %v669_v30 = vpop.eup %668 }
 0x345   : > { %v453_v31 = vmul.f32 %v669_v30, %v451_v29  ;;  %vm458_vm4 = vweird.f32 %v669_v30 }
 0x346   : > { %vm459_vm6 = vmor %vm457_vm5, %vm458_vm4 }
 0x347   : > { %v454_v32 = vsub.f32 1.0, %v453_v31 }
 0x349   : > { %v455_v34 = vmul.f32 %v669_v30, %v454_v32 }
 0x34b   : > { %v456_v36 = vadd.f32 %v669_v30, %v455_v34 }
 0x34d   : > { %v460_v38 = vsel %vm459_vm6, %v669_v30, %v456_v36 }
 0x34e   : > { %v465_v39 = vsel %vm462_vm7, %v464_v37, %v460_v38 }
 0x34f   : > { %467 = vst [vmem:[%s161_s29] sm:$0x7] %v465_v39 }
 0x350   : > { %697 = shalt.err (!%p694_p3)
}
 0x351   : > { %616 = dma.vmem_to_hbm [thread:$0]  (%p796_p5), %s482_s30, 64, %s484_s4, %s469_s16  }
 0x352 PF: > { %p622_p4 = scmp.ge.s32.totalorder %s732_s15, 2  ;;  %s495_s17 = sand.u32 1, %s720_s12  }
 0x353   : > { %s496_s19 = scalar_lea.sflag [#allocation3], %s495_s17 }
 0x354   : > { %p619_p7 = pnand %p622_p4, %p800_p6 }
 0x356   : > { %p620_p8 = pneg %p619_p7 }
 0x358   : > { %715 = dma.done.wait (%p620_p8), %s496_s19, 64  }
 0x359   : > { %717 = vsyncadd (%p620_p8), %s496_s19, 4294967232  ;;  %p13_p9 = scmp.ge.s32.totalorder %s783_s18, 4   ;;  %s910_s12 = smov %s724_s13 }
 0x35a   : > { %s911_s13 = smov %s728_s14  ;;  %s912_s14 = smov %s794_s21 }
 0x35b   : > { %s913_s15 = smov %s783_s18  ;;  %15 = sbr.rel (!%p13_p9) target bundleno = 3 (0x3), region = 67 }
 0x360   :  { %502 = vsyncpa [#allocation3], 1 }
 0x361   :  { %504 = vsyncpa [#allocation3 + $0x1], 1 }

</bundles_post_ra>
